<compile_context>
chip_gen: v7x
topology: tpu7x:2x2x1
jax: 0.10.0
libtpu: 0.0.40
codegen_flags: <defaults>
</compile_context>

<pallas_src>
import functools

import jax
import jax.numpy as jnp
from jax import lax
from jax.experimental import pallas as pl
from jax.experimental.pallas import tpu as pltpu


# ------------------------------ fused kernel --------------------------------
def _tcn_stack_kernel(*refs, config, tile_l, kernel_size, compute_dtype):
  """Fused TCN residual-block stack for one (batch, L-tile) grid cell.

  Positional refs:
    x_ref                                   (C0, TILE_L)
    per block: w1_aug (R1, K*Cin)           R1 = 2*Cout if fused residual else Cout
               w2     (Cout, K*Cout)
               bias   (R1 + Cout, 1)        [b1 (+ br)] ++ b2, f32
    o_ref                                   (C_last, TILE_L)
    per block scratch:
               ext1 (Cin,  pad + TILE_L)    conv1 halo + current tile
               col1 (K*Cin,  TILE_L)        conv1 im2col slab
               ext2 (Cout, pad + TILE_L)    conv2 halo + current tile
               col2 (K*Cout, TILE_L)        conv2 im2col slab
  config: tuple of (cin, cout, dilation, pad, has_res) per block (static).
  """
  n_blocks = len(config)
  x_ref = refs[0]
  w_refs = refs[1:1 + 3 * n_blocks]
  o_ref = refs[1 + 3 * n_blocks]
  s_refs = refs[2 + 3 * n_blocks:]

  # Zero only the carried halo columns, and only at the first L tile of each
  # sequence.  This IS the causal zero padding; the scratch persists across
  # grid steps, so nothing else ever needs re-zeroing (every col row-block is
  # fully rewritten each step).
  @pl.when(pl.program_id(1) == 0)
  def _():
    for bi, (cin, cout, _, pad, _) in enumerate(config):
      e1 = s_refs[4 * bi]
      e2 = s_refs[4 * bi + 2]
      e1[:, 0:pad] = jnp.zeros((cin, pad), e1.dtype)
      e2[:, 0:pad] = jnp.zeros((cout, pad), e2.dtype)

  def fold_conv(ext, col, x_in, w_ref, dil, pad, cdim):
    """One causal dilated conv as a single (R, K*C) x (K*C, T) MXU matmul."""
    # ext columns [0, pad) hold the last `pad` inputs of the previous L tile
    # (zeros at tile 0); columns [pad, pad+T) receive the current tile.
    ext[:, pad:] = x_in
    # im2col: K sublane-stacked shifted copies (lane-unaligned reads lower to
    # XLU rotates, which have slack; no full-tile relayout copies expected).
    for j in range(kernel_size):
      col[j * cdim:(j + 1) * cdim, :] = ext[:, j * dil:j * dil + tile_l]
    # Carry the last `pad` input columns into the halo for the next L tile.
    # (RHS is loaded before the store, so overlapping src/dst is fine.)
    ext[:, 0:pad] = ext[:, tile_l:tile_l + pad]
    return jnp.dot(w_ref[...], col[...], preferred_element_type=jnp.float32)

  # In-kernel cast (VPU filler hidden under the matmuls) instead of a
  # wrapper-side full-tensor HBM cast.
  cur = x_ref[...].astype(compute_dtype)                # (C0, TILE_L)

  for bi, (cin, cout, dil, pad, has_res) in enumerate(config):
    w1_ref, w2_ref, b_ref = w_refs[3 * bi:3 * bi + 3]
    e1, c1, e2, c2 = s_refs[4 * bi:4 * bi + 4]
    r1 = 2 * cout if has_res else cout

    # conv1 (+ fused 1x1 residual rows) -> bias -> split -> ReLU.  f32.
    pre = fold_conv(e1, c1, cur, w1_ref, dil, pad, cin) + b_ref[0:r1]
    h = jnp.maximum(pre[0:cout], 0.0)
    res = pre[cout:r1] if has_res else cur.astype(jnp.float32)

    # conv2 -> bias -> ReLU.  f32.
    out = fold_conv(e2, c2, h.astype(compute_dtype), w2_ref, dil, pad, cout)
    out = jnp.maximum(out + b_ref[r1:r1 + cout], 0.0)

    y = res + out                                        # f32 residual add
    if bi == n_blocks - 1:
      o_ref[...] = y.astype(o_ref.dtype)
    else:
      cur = y.astype(compute_dtype)


# -------------------------------- wrapper ------------------------------------
def _pick_tile_l(seq_len, target):
  """Multiple-of-128 tile <= target; short sequences use one full-extent tile.
  Non-dividing tiles are fine: the grid uses cdiv and the ragged last tile is
  masked on write (causal convs are column-local, so OOB garbage never leaks
  into valid columns, and the carried halo is re-zeroed at l == 0)."""
  if seq_len <= max(target, 128):
    return seq_len
  return max(128, (target // 128) * 128)


def _rup(x, m):
  return -(-x // m) * m


def _vmem_tile_bytes(rows, cols, dtype):
  it = jnp.dtype(dtype).itemsize
  sub = 8 * max(1, 4 // it)          # 8 sublanes for f32, 16 for bf16, ...
  return _rup(max(rows, 1), sub) * _rup(max(cols, 1), 128) * it


def tcn_forward(x_ncw, params, kernel_size, *, compute_dtype=jnp.float32,
                tile_l_target=1024):
  """Full fused TCN forward.  x_ncw: (B, C0, L) -> (B, C_last, L)."""
  assert kernel_size >= 2
  batch, c0, seq_len = x_ncw.shape
  tile_l = _pick_tile_l(seq_len, tile_l_target)
  n_tiles = pl.cdiv(seq_len, tile_l)

  config = []
  inputs = [x_ncw]                      # native dtype; cast happens in-kernel
  in_specs = [pl.BlockSpec((pl.Squeezed(), c0, tile_l), lambda b, l: (b, 0, l))]
  scratch_shapes = []
  c_prev = c0
  for i, (w1, b1, w2, b2, wr, br) in enumerate(params):
    dilation = 2 ** i
    cout, cin, k = w1.shape
    assert cin == c_prev and k == kernel_size
    pad = dilation * (kernel_size - 1)
    has_res = wr is not None
    config.append((cin, cout, dilation, pad, has_res))

    # Fold taps: PyTorch (O, I, K) -> (O, K*I); column block j holds tap j.
    w1f = jnp.transpose(w1, (0, 2, 1)).reshape(cout, kernel_size * cin)
    if has_res:
      # Fuse the 1x1 residual as extra output rows aligned with tap K-1
      # (the tap whose im2col rows hold x[t] itself).
      wr_rows = jnp.zeros((cout, kernel_size * cin), w1f.dtype)
      wr_rows = wr_rows.at[:, (kernel_size - 1) * cin:].set(wr[:, :, 0])
      w1_aug = jnp.concatenate([w1f, wr_rows], axis=0)
      b1_aug = jnp.concatenate([b1, br], axis=0)
    else:
      w1_aug, b1_aug = w1f, b1
    w2f = jnp.transpose(w2, (0, 2, 1)).reshape(cout, kernel_size * cout)
    bias_all = jnp.concatenate([b1_aug, b2], axis=0).reshape(-1, 1)
    r1 = w1_aug.shape[0]

    inputs += [w1_aug.astype(compute_dtype), w2f.astype(compute_dtype),
               bias_all.astype(jnp.float32)]
    in_specs += [pl.BlockSpec((r1, kernel_size * cin), lambda b, l: (0, 0)),
                 pl.BlockSpec((cout, kernel_size * cout), lambda b, l: (0, 0)),
                 pl.BlockSpec((r1 + cout, 1), lambda b, l: (0, 0))]
    # Carried causal halo + im2col slab, per conv (single-buffered scratch).
    scratch_shapes += [
        pltpu.VMEM((cin, pad + tile_l), compute_dtype),
        pltpu.VMEM((kernel_size * cin, tile_l), compute_dtype),
        pltpu.VMEM((cout, pad + tile_l), compute_dtype),
        pltpu.VMEM((kernel_size * cout, tile_l), compute_dtype)]
    c_prev = cout
  c_last = c_prev

  kernel = functools.partial(
      _tcn_stack_kernel, config=tuple(config), tile_l=tile_l,
      kernel_size=kernel_size, compute_dtype=compute_dtype)

  # Advisory cost estimate.
  flops_per_col = 0
  for (cin, cout, _, _, has_res) in config:
    r1 = 2 * cout if has_res else cout
    flops_per_col += 2 * kernel_size * cin * r1        # conv1 (+ fused 1x1)
    flops_per_col += 2 * kernel_size * cout * cout     # conv2
  weight_bytes = sum(int(a.size) * a.dtype.itemsize for a in inputs[1:])
  cost = pl.CostEstimate(
      flops=int(flops_per_col) * batch * seq_len,
      transcendentals=0,
      bytes_accessed=int(batch * seq_len * (c0 + c_last)
                         * x_ncw.dtype.itemsize) + weight_bytes)

  # Explicit VMEM budget (scratch 1x, I/O blocks + weights double-buffered),
  # clamped to 64 MiB so the request is valid on v7x as well as v5e/v6e.
  vm_est = 0
  for (cin, cout, _, pad, _) in config:
    vm_est += _vmem_tile_bytes(cin, pad + tile_l, compute_dtype)
    vm_est += _vmem_tile_bytes(kernel_size * cin, tile_l, compute_dtype)
    vm_est += _vmem_tile_bytes(cout, pad + tile_l, compute_dtype)
    vm_est += _vmem_tile_bytes(kernel_size * cout, tile_l, compute_dtype)
  vm_est += 2 * _vmem_tile_bytes(c0, tile_l, x_ncw.dtype)
  vm_est += 2 * _vmem_tile_bytes(c_last, tile_l, x_ncw.dtype)
  for a in inputs[1:]:
    vm_est += 2 * _vmem_tile_bytes(a.shape[0], a.shape[-1], a.dtype)
  vmem_limit = int(min(64 << 20, max(32 << 20, 2 * vm_est)))

  # NOTE: batch is the only "parallel" grid axis (v7x megacore sharding);
  # batch-blocking G>1 rows per step is a possible further win but is not
  # needed at these channel counts.
  return pl.pallas_call(
      kernel,
      out_shape=jax.ShapeDtypeStruct((batch, c_last, seq_len), x_ncw.dtype),
      grid_spec=pltpu.PrefetchScalarGridSpec(
          num_scalar_prefetch=0,
          grid=(batch, n_tiles),
          in_specs=in_specs,
          out_specs=pl.BlockSpec((pl.Squeezed(), c_last, tile_l),
                                 lambda b, l: (b, 0, l)),
          scratch_shapes=scratch_shapes,
      ),
      compiler_params=pltpu.CompilerParams(
          dimension_semantics=("parallel", "arbitrary"),
          vmem_limit_bytes=vmem_limit),
      cost_estimate=cost,
  )(*inputs)


# ----------------------------- parameter setup ------------------------------
def _weight_norm(v):
  # PyTorch weight_norm (dim=0): w = g * v / ||v||_2 with g initialised to the
  # per-output-channel norm, so at init the effective weight equals v.
  norm = jnp.sqrt(jnp.sum(v * v, axis=(1, 2), keepdims=True))
  g = norm
  return g * v / norm


def init_tcn_params(key, channels_list, kernel_size):
  params = []
  for i in range(len(channels_list) - 1):
    cin, cout = channels_list[i], channels_list[i + 1]
    key, k1, k2, k3, k4, k5, k6 = jax.random.split(key, 7)
    v1 = 0.01 * jax.random.normal(k1, (cout, cin, kernel_size), jnp.float32)
    w1 = _weight_norm(v1)
    b1 = 0.1 * jax.random.normal(k2, (cout,), jnp.float32)
    v2 = 0.01 * jax.random.normal(k3, (cout, cout, kernel_size), jnp.float32)
    w2 = _weight_norm(v2)
    b2 = 0.1 * jax.random.normal(k4, (cout,), jnp.float32)
    if cin != cout:
      wr = 0.01 * jax.random.normal(k5, (cout, cin, 1), jnp.float32)
      br = 0.1 * jax.random.normal(k6, (cout,), jnp.float32)
    else:
      wr, br = None, None
    params.append((w1, b1, w2, b2, wr, br))
  return params


# -------------------------- pure-JAX reference ------------------------------
def _causal_conv1d_ref(x_ncw, w_oik, b, dilation):
  k = w_oik.shape[-1]
  pad = dilation * (k - 1)
  y = lax.conv_general_dilated(
      x_ncw, w_oik, window_strides=(1,), padding=[(pad, 0)],
      rhs_dilation=(dilation,), dimension_numbers=("NCH", "OIH", "NCH"))
  return y + b[None, :, None]


def tcn_reference(x_ncw, params, kernel_size):
  out = x_ncw
  for i, (w1, b1, w2, b2, wr, br) in enumerate(params):
    d = 2 ** i
    h = jax.nn.relu(_causal_conv1d_ref(out, w1, b1, d))
    h = jax.nn.relu(_causal_conv1d_ref(h, w2, b2, d))
    res = out if wr is None else _causal_conv1d_ref(out, wr, br, 1)
    out = res + h
  return out


if __name__ == "__main__":
  channels_list = [4, 8, 8]      # two residual blocks, dilations 1 and 2
  kernel_size = 3
  batch, seq_len = 2, 16

  key = jax.random.PRNGKey(0)
  kx, kp, kx2, kx3 = jax.random.split(key, 4)
  x = jax.random.normal(kx, (batch, channels_list[0], seq_len), jnp.float32)
  params = init_tcn_params(kp, channels_list, kernel_size)

  # f32 path, tight check against the pure-JAX reference.
  y = jax.block_until_ready(tcn_forward(x, params, kernel_size))
  y_ref = tcn_reference(x, params, kernel_size)
  assert y.shape == (batch, channels_list[-1], seq_len), y.shape
  err = float(jnp.max(jnp.abs(y - y_ref)))
  assert jnp.allclose(y, y_ref, atol=1e-5, rtol=1e-5), err

  # bf16 matmul operands with f32 accumulation -- looser tolerance vs f32 ref.
  y_bf = jax.block_until_ready(
      tcn_forward(x, params, kernel_size, compute_dtype=jnp.bfloat16))
  err_bf = float(jnp.max(jnp.abs(y_bf - y_ref)))
  assert jnp.allclose(y_bf, y_ref, atol=5e-2, rtol=5e-2), err_bf

  # Longer sequence exercising the L-tiling + carried-causal-halo path.
  x_long = jax.random.normal(kx2, (batch, channels_list[0], 256), jnp.float32)
  y_long = jax.block_until_ready(
      tcn_forward(x_long, params, kernel_size, tile_l_target=128))
  y_long_ref = tcn_reference(x_long, params, kernel_size)
  err_long = float(jnp.max(jnp.abs(y_long - y_long_ref)))
  assert jnp.allclose(y_long, y_long_ref, atol=1e-5, rtol=1e-5), err_long

  # Ragged sequence (not a multiple of the L tile) exercising the masked
  # last-tile path of the cdiv grid.
  x_rag = jax.random.normal(kx3, (batch, channels_list[0], 200), jnp.float32)
  y_rag = jax.block_until_ready(
      tcn_forward(x_rag, params, kernel_size, tile_l_target=128))
  y_rag_ref = tcn_reference(x_rag, params, kernel_size)
  err_rag = float(jnp.max(jnp.abs(y_rag - y_rag_ref)))
  assert jnp.allclose(y_rag, y_rag_ref, atol=1e-5, rtol=1e-5), err_rag

  print("KERNEL_OK")
</pallas_src>

<mosaic_0001>
module attributes {stable_mosaic.version = 11 : i64} {
  func.func @_tcn_stack_kernel(%arg0: i32, %arg1: i32, %arg2: memref<1x4x16xf32, #tpu.memory_space<vmem>>, %arg3: memref<16x12xf32, #tpu.memory_space<vmem>>, %arg4: memref<8x24xf32, #tpu.memory_space<vmem>>, %arg5: memref<24x1xf32, #tpu.memory_space<vmem>>, %arg6: memref<8x24xf32, #tpu.memory_space<vmem>>, %arg7: memref<8x24xf32, #tpu.memory_space<vmem>>, %arg8: memref<16x1xf32, #tpu.memory_space<vmem>>, %arg9: memref<1x8x16xf32, #tpu.memory_space<vmem>>, %arg10: memref<4x18xf32, #tpu.memory_space<vmem>>, %arg11: memref<12x16xf32, #tpu.memory_space<vmem>>, %arg12: memref<8x18xf32, #tpu.memory_space<vmem>>, %arg13: memref<24x16xf32, #tpu.memory_space<vmem>>, %arg14: memref<8x20xf32, #tpu.memory_space<vmem>>, %arg15: memref<24x16xf32, #tpu.memory_space<vmem>>, %arg16: memref<8x20xf32, #tpu.memory_space<vmem>>, %arg17: memref<24x16xf32, #tpu.memory_space<vmem>>) attributes {dimension_semantics = [#tpu.dimension_semantics<parallel>, #tpu.dimension_semantics<arbitrary>], iteration_bounds = array<i64: 2, 1>, scalar_prefetch = 0 : i64, scratch_operands = 8 : i64, tpu.core_type = #tpu.core_type<tc>, window_params = [{transform_indices = @transform_0, window_bounds = array<i64: 1, 4, 16>}, {pipeline_mode = #tpu.pipeline_mode<synchronous>, transform_indices = @transform_1, window_bounds = array<i64: 16, 12>}, {pipeline_mode = #tpu.pipeline_mode<synchronous>, transform_indices = @transform_2, window_bounds = array<i64: 8, 24>}, {pipeline_mode = #tpu.pipeline_mode<synchronous>, transform_indices = @transform_3, window_bounds = array<i64: 24, 1>}, {pipeline_mode = #tpu.pipeline_mode<synchronous>, transform_indices = @transform_4, window_bounds = array<i64: 8, 24>}, {pipeline_mode = #tpu.pipeline_mode<synchronous>, transform_indices = @transform_5, window_bounds = array<i64: 8, 24>}, {pipeline_mode = #tpu.pipeline_mode<synchronous>, transform_indices = @transform_6, window_bounds = array<i64: 16, 1>}, {transform_indices = @transform_7, window_bounds = array<i64: 1, 8, 16>}]} {
    %c0_i32 = arith.constant 0 : i32
    %0 = arith.cmpi eq, %arg1, %c0_i32 : i32
    %1 = arith.extui %0 : i1 to i32
    %c0_i32_0 = arith.constant 0 : i32
    %2 = arith.cmpi ne, %1, %c0_i32_0 : i32
    scf.if %2 {
      %cst_104 = arith.constant 0.000000e+00 : f32
      %80 = vector.broadcast %cst_104 : f32 to vector<4x2xf32>
      %c0_105 = arith.constant 0 : index
      %c0_106 = arith.constant 0 : index
      %81 = vector.load %arg10[%c0_105, %c0_106] : memref<4x18xf32, #tpu.memory_space<vmem>>, vector<4x2xf32>
      tpu.vector_store %arg10[%c0_105, %c0_106], %80 {strides = array<i32>} : memref<4x18xf32, #tpu.memory_space<vmem>>, vector<4x2xf32>,
      %cst_107 = arith.constant 0.000000e+00 : f32
      %82 = vector.broadcast %cst_107 : f32 to vector<8x2xf32>
      %c0_108 = arith.constant 0 : index
      %c0_109 = arith.constant 0 : index
      %83 = vector.load %arg12[%c0_108, %c0_109] : memref<8x18xf32, #tpu.memory_space<vmem>>, vector<8x2xf32>
      tpu.vector_store %arg12[%c0_108, %c0_109], %82 {strides = array<i32>} : memref<8x18xf32, #tpu.memory_space<vmem>>, vector<8x2xf32>,
      %cst_110 = arith.constant 0.000000e+00 : f32
      %84 = vector.broadcast %cst_110 : f32 to vector<8x4xf32>
      %c0_111 = arith.constant 0 : index
      %c0_112 = arith.constant 0 : index
      %85 = vector.load %arg14[%c0_111, %c0_112] : memref<8x20xf32, #tpu.memory_space<vmem>>, vector<8x4xf32>
      tpu.vector_store %arg14[%c0_111, %c0_112], %84 {strides = array<i32>} : memref<8x20xf32, #tpu.memory_space<vmem>>, vector<8x4xf32>,
      %cst_113 = arith.constant 0.000000e+00 : f32
      %86 = vector.broadcast %cst_113 : f32 to vector<8x4xf32>
      %c0_114 = arith.constant 0 : index
      %c0_115 = arith.constant 0 : index
      %87 = vector.load %arg16[%c0_114, %c0_115] : memref<8x20xf32, #tpu.memory_space<vmem>>, vector<8x4xf32>
      tpu.vector_store %arg16[%c0_114, %c0_115], %86 {strides = array<i32>} : memref<8x20xf32, #tpu.memory_space<vmem>>, vector<8x4xf32>,
    } else {
    }
    %c0 = arith.constant 0 : index
    %c0_1 = arith.constant 0 : index
    %c0_2 = arith.constant 0 : index
    %3 = vector.load %arg2[%c0, %c0_1, %c0_2] : memref<1x4x16xf32, #tpu.memory_space<vmem>>, vector<1x4x16xf32>
    %4 = vector.shape_cast %3 : vector<1x4x16xf32> to vector<4x16xf32>
    %c0_3 = arith.constant 0 : index
    %c2 = arith.constant 2 : index
    %5 = vector.load %arg10[%c0_3, %c2] : memref<4x18xf32, #tpu.memory_space<vmem>>, vector<4x16xf32>
    tpu.vector_store %arg10[%c0_3, %c2], %4 {strides = array<i32>} : memref<4x18xf32, #tpu.memory_space<vmem>>, vector<4x16xf32>,
    %c0_4 = arith.constant 0 : index
    %c0_5 = arith.constant 0 : index
    %6 = vector.load %arg10[%c0_4, %c0_5] : memref<4x18xf32, #tpu.memory_space<vmem>>, vector<4x16xf32>
    %c0_6 = arith.constant 0 : index
    %c0_7 = arith.constant 0 : index
    %7 = vector.load %arg11[%c0_6, %c0_7] : memref<12x16xf32, #tpu.memory_space<vmem>>, vector<4x16xf32>
    tpu.vector_store %arg11[%c0_6, %c0_7], %6 {strides = array<i32>} : memref<12x16xf32, #tpu.memory_space<vmem>>, vector<4x16xf32>,
    %c0_8 = arith.constant 0 : index
    %c1 = arith.constant 1 : index
    %8 = vector.load %arg10[%c0_8, %c1] : memref<4x18xf32, #tpu.memory_space<vmem>>, vector<4x16xf32>
    %c4 = arith.constant 4 : index
    %c0_9 = arith.constant 0 : index
    %9 = vector.load %arg11[%c4, %c0_9] : memref<12x16xf32, #tpu.memory_space<vmem>>, vector<4x16xf32>
    tpu.vector_store %arg11[%c4, %c0_9], %8 {strides = array<i32>} : memref<12x16xf32, #tpu.memory_space<vmem>>, vector<4x16xf32>,
    %c0_10 = arith.constant 0 : index
    %c2_11 = arith.constant 2 : index
    %10 = vector.load %arg10[%c0_10, %c2_11] : memref<4x18xf32, #tpu.memory_space<vmem>>, vector<4x16xf32>
    %c8 = arith.constant 8 : index
    %c0_12 = arith.constant 0 : index
    %11 = vector.load %arg11[%c8, %c0_12] : memref<12x16xf32, #tpu.memory_space<vmem>>, vector<4x16xf32>
    tpu.vector_store %arg11[%c8, %c0_12], %10 {strides = array<i32>} : memref<12x16xf32, #tpu.memory_space<vmem>>, vector<4x16xf32>,
    %c0_13 = arith.constant 0 : index
    %c16 = arith.constant 16 : index
    %12 = vector.load %arg10[%c0_13, %c16] : memref<4x18xf32, #tpu.memory_space<vmem>>, vector<4x2xf32>
    %c0_14 = arith.constant 0 : index
    %c0_15 = arith.constant 0 : index
    %13 = vector.load %arg10[%c0_14, %c0_15] : memref<4x18xf32, #tpu.memory_space<vmem>>, vector<4x2xf32>
    tpu.vector_store %arg10[%c0_14, %c0_15], %12 {strides = array<i32>} : memref<4x18xf32, #tpu.memory_space<vmem>>, vector<4x2xf32>,
    %c0_16 = arith.constant 0 : index
    %c0_17 = arith.constant 0 : index
    %14 = vector.load %arg3[%c0_16, %c0_17] : memref<16x12xf32, #tpu.memory_space<vmem>>, vector<16x12xf32>
    %c0_18 = arith.constant 0 : index
    %c0_19 = arith.constant 0 : index
    %15 = vector.load %arg11[%c0_18, %c0_19] : memref<12x16xf32, #tpu.memory_space<vmem>>, vector<12x16xf32>
    %cst = arith.constant dense<0.000000e+00> : vector<16x16xf32>
    %16 = tpu.matmul %14, %15, %cst {dimension_numbers = #tpu.dot_dimension_numbers<[1], [0], [0], [1], [0, 0, 1, 1], [], []>} : vector<16x12xf32>, vector<12x16xf32>, vector<16x16xf32> -> vector<16x16xf32>
    %c0_20 = arith.constant 0 : index
    %c0_21 = arith.constant 0 : index
    %17 = vector.load %arg5[%c0_20, %c0_21] : memref<24x1xf32, #tpu.memory_space<vmem>>, vector<16x1xf32>
    %18 = vector.broadcast %17 : vector<16x1xf32> to vector<16x16xf32>
    %19 = arith.addf %16, %18 : vector<16x16xf32>
    %20 = vector.extract_strided_slice %19 {offsets = [0, 0], sizes = [8, 16], strides = [1, 1]} : vector<16x16xf32> to vector<8x16xf32>
    %cst_22 = arith.constant 0.000000e+00 : f32
    %21 = vector.broadcast %cst_22 : f32 to vector<8x16xf32>
    %22 = arith.maximumf %20, %21 : vector<8x16xf32>
    %23 = vector.extract_strided_slice %19 {offsets = [8, 0], sizes = [8, 16], strides = [1, 1]} : vector<16x16xf32> to vector<8x16xf32>
    %c0_23 = arith.constant 0 : index
    %c2_24 = arith.constant 2 : index
    %24 = vector.load %arg12[%c0_23, %c2_24] : memref<8x18xf32, #tpu.memory_space<vmem>>, vector<8x16xf32>
    tpu.vector_store %arg12[%c0_23, %c2_24], %22 {strides = array<i32>} : memref<8x18xf32, #tpu.memory_space<vmem>>, vector<8x16xf32>,
    %c0_25 = arith.constant 0 : index
    %c0_26 = arith.constant 0 : index
    %25 = vector.load %arg12[%c0_25, %c0_26] : memref<8x18xf32, #tpu.memory_space<vmem>>, vector<8x16xf32>
    %c0_27 = arith.constant 0 : index
    %c0_28 = arith.constant 0 : index
    %26 = vector.load %arg13[%c0_27, %c0_28] : memref<24x16xf32, #tpu.memory_space<vmem>>, vector<8x16xf32>
    tpu.vector_store %arg13[%c0_27, %c0_28], %25 {strides = array<i32>} : memref<24x16xf32, #tpu.memory_space<vmem>>, vector<8x16xf32>,
    %c0_29 = arith.constant 0 : index
    %c1_30 = arith.constant 1 : index
    %27 = vector.load %arg12[%c0_29, %c1_30] : memref<8x18xf32, #tpu.memory_space<vmem>>, vector<8x16xf32>
    %c8_31 = arith.constant 8 : index
    %c0_32 = arith.constant 0 : index
    %28 = vector.load %arg13[%c8_31, %c0_32] : memref<24x16xf32, #tpu.memory_space<vmem>>, vector<8x16xf32>
    tpu.vector_store %arg13[%c8_31, %c0_32], %27 {strides = array<i32>} : memref<24x16xf32, #tpu.memory_space<vmem>>, vector<8x16xf32>,
    %c0_33 = arith.constant 0 : index
    %c2_34 = arith.constant 2 : index
    %29 = vector.load %arg12[%c0_33, %c2_34] : memref<8x18xf32, #tpu.memory_space<vmem>>, vector<8x16xf32>
    %c16_35 = arith.constant 16 : index
    %c0_36 = arith.constant 0 : index
    %30 = vector.load %arg13[%c16_35, %c0_36] : memref<24x16xf32, #tpu.memory_space<vmem>>, vector<8x16xf32>
    tpu.vector_store %arg13[%c16_35, %c0_36], %29 {strides = array<i32>} : memref<24x16xf32, #tpu.memory_space<vmem>>, vector<8x16xf32>,
    %c0_37 = arith.constant 0 : index
    %c16_38 = arith.constant 16 : index
    %31 = vector.load %arg12[%c0_37, %c16_38] : memref<8x18xf32, #tpu.memory_space<vmem>>, vector<8x2xf32>
    %c0_39 = arith.constant 0 : index
    %c0_40 = arith.constant 0 : index
    %32 = vector.load %arg12[%c0_39, %c0_40] : memref<8x18xf32, #tpu.memory_space<vmem>>, vector<8x2xf32>
    tpu.vector_store %arg12[%c0_39, %c0_40], %31 {strides = array<i32>} : memref<8x18xf32, #tpu.memory_space<vmem>>, vector<8x2xf32>,
    %c0_41 = arith.constant 0 : index
    %c0_42 = arith.constant 0 : index
    %33 = vector.load %arg4[%c0_41, %c0_42] : memref<8x24xf32, #tpu.memory_space<vmem>>, vector<8x24xf32>
    %c0_43 = arith.constant 0 : index
    %c0_44 = arith.constant 0 : index
    %34 = vector.load %arg13[%c0_43, %c0_44] : memref<24x16xf32, #tpu.memory_space<vmem>>, vector<24x16xf32>
    %cst_45 = arith.constant dense<0.000000e+00> : vector<8x16xf32>
    %35 = tpu.matmul %33, %34, %cst_45 {dimension_numbers = #tpu.dot_dimension_numbers<[1], [0], [0], [1], [0, 0, 1, 1], [], []>} : vector<8x24xf32>, vector<24x16xf32>, vector<8x16xf32> -> vector<8x16xf32>
    %c16_46 = arith.constant 16 : index
    %c0_47 = arith.constant 0 : index
    %36 = vector.load %arg5[%c16_46, %c0_47] : memref<24x1xf32, #tpu.memory_space<vmem>>, vector<8x1xf32>
    %37 = vector.broadcast %36 : vector<8x1xf32> to vector<8x16xf32>
    %38 = arith.addf %35, %37 : vector<8x16xf32>
    %cst_48 = arith.constant 0.000000e+00 : f32
    %39 = vector.broadcast %cst_48 : f32 to vector<8x16xf32>
    %40 = arith.maximumf %38, %39 : vector<8x16xf32>
    %41 = arith.addf %23, %40 : vector<8x16xf32>
    %c0_49 = arith.constant 0 : index
    %c4_50 = arith.constant 4 : index
    %42 = vector.load %arg14[%c0_49, %c4_50] : memref<8x20xf32, #tpu.memory_space<vmem>>, vector<8x16xf32>
    tpu.vector_store %arg14[%c0_49, %c4_50], %41 {strides = array<i32>} : memref<8x20xf32, #tpu.memory_space<vmem>>, vector<8x16xf32>,
    %c0_51 = arith.constant 0 : index
    %c0_52 = arith.constant 0 : index
    %43 = vector.load %arg14[%c0_51, %c0_52] : memref<8x20xf32, #tpu.memory_space<vmem>>, vector<8x16xf32>
    %c0_53 = arith.constant 0 : index
    %c0_54 = arith.constant 0 : index
    %44 = vector.load %arg15[%c0_53, %c0_54] : memref<24x16xf32, #tpu.memory_space<vmem>>, vector<8x16xf32>
    tpu.vector_store %arg15[%c0_53, %c0_54], %43 {strides = array<i32>} : memref<24x16xf32, #tpu.memory_space<vmem>>, vector<8x16xf32>,
    %c0_55 = arith.constant 0 : index
    %c2_56 = arith.constant 2 : index
    %45 = vector.load %arg14[%c0_55, %c2_56] : memref<8x20xf32, #tpu.memory_space<vmem>>, vector<8x16xf32>
    %c8_57 = arith.constant 8 : index
    %c0_58 = arith.constant 0 : index
    %46 = vector.load %arg15[%c8_57, %c0_58] : memref<24x16xf32, #tpu.memory_space<vmem>>, vector<8x16xf32>
    tpu.vector_store %arg15[%c8_57, %c0_58], %45 {strides = array<i32>} : memref<24x16xf32, #tpu.memory_space<vmem>>, vector<8x16xf32>,
    %c0_59 = arith.constant 0 : index
    %c4_60 = arith.constant 4 : index
    %47 = vector.load %arg14[%c0_59, %c4_60] : memref<8x20xf32, #tpu.memory_space<vmem>>, vector<8x16xf32>
    %c16_61 = arith.constant 16 : index
    %c0_62 = arith.constant 0 : index
    %48 = vector.load %arg15[%c16_61, %c0_62] : memref<24x16xf32, #tpu.memory_space<vmem>>, vector<8x16xf32>
    tpu.vector_store %arg15[%c16_61, %c0_62], %47 {strides = array<i32>} : memref<24x16xf32, #tpu.memory_space<vmem>>, vector<8x16xf32>,
    %c0_63 = arith.constant 0 : index
    %c16_64 = arith.constant 16 : index
    %49 = vector.load %arg14[%c0_63, %c16_64] : memref<8x20xf32, #tpu.memory_space<vmem>>, vector<8x4xf32>
    %c0_65 = arith.constant 0 : index
    %c0_66 = arith.constant 0 : index
    %50 = vector.load %arg14[%c0_65, %c0_66] : memref<8x20xf32, #tpu.memory_space<vmem>>, vector<8x4xf32>
    tpu.vector_store %arg14[%c0_65, %c0_66], %49 {strides = array<i32>} : memref<8x20xf32, #tpu.memory_space<vmem>>, vector<8x4xf32>,
    %c0_67 = arith.constant 0 : index
    %c0_68 = arith.constant 0 : index
    %51 = vector.load %arg6[%c0_67, %c0_68] : memref<8x24xf32, #tpu.memory_space<vmem>>, vector<8x24xf32>
    %c0_69 = arith.constant 0 : index
    %c0_70 = arith.constant 0 : index
    %52 = vector.load %arg15[%c0_69, %c0_70] : memref<24x16xf32, #tpu.memory_space<vmem>>, vector<24x16xf32>
    %cst_71 = arith.constant dense<0.000000e+00> : vector<8x16xf32>
    %53 = tpu.matmul %51, %52, %cst_71 {dimension_numbers = #tpu.dot_dimension_numbers<[1], [0], [0], [1], [0, 0, 1, 1], [], []>} : vector<8x24xf32>, vector<24x16xf32>, vector<8x16xf32> -> vector<8x16xf32>
    %c0_72 = arith.constant 0 : index
    %c0_73 = arith.constant 0 : index
    %54 = vector.load %arg8[%c0_72, %c0_73] : memref<16x1xf32, #tpu.memory_space<vmem>>, vector<8x1xf32>
    %55 = vector.broadcast %54 : vector<8x1xf32> to vector<8x16xf32>
    %56 = arith.addf %53, %55 : vector<8x16xf32>
    %cst_74 = arith.constant 0.000000e+00 : f32
    %57 = vector.broadcast %cst_74 : f32 to vector<8x16xf32>
    %58 = arith.maximumf %56, %57 : vector<8x16xf32>
    %c0_75 = arith.constant 0 : index
    %c4_76 = arith.constant 4 : index
    %59 = vector.load %arg16[%c0_75, %c4_76] : memref<8x20xf32, #tpu.memory_space<vmem>>, vector<8x16xf32>
    tpu.vector_store %arg16[%c0_75, %c4_76], %58 {strides = array<i32>} : memref<8x20xf32, #tpu.memory_space<vmem>>, vector<8x16xf32>,
    %c0_77 = arith.constant 0 : index
    %c0_78 = arith.constant 0 : index
    %60 = vector.load %arg16[%c0_77, %c0_78] : memref<8x20xf32, #tpu.memory_space<vmem>>, vector<8x16xf32>
    %c0_79 = arith.constant 0 : index
    %c0_80 = arith.constant 0 : index
    %61 = vector.load %arg17[%c0_79, %c0_80] : memref<24x16xf32, #tpu.memory_space<vmem>>, vector<8x16xf32>
    tpu.vector_store %arg17[%c0_79, %c0_80], %60 {strides = array<i32>} : memref<24x16xf32, #tpu.memory_space<vmem>>, vector<8x16xf32>,
    %c0_81 = arith.constant 0 : index
    %c2_82 = arith.constant 2 : index
    %62 = vector.load %arg16[%c0_81, %c2_82] : memref<8x20xf32, #tpu.memory_space<vmem>>, vector<8x16xf32>
    %c8_83 = arith.constant 8 : index
    %c0_84 = arith.constant 0 : index
    %63 = vector.load %arg17[%c8_83, %c0_84] : memref<24x16xf32, #tpu.memory_space<vmem>>, vector<8x16xf32>
    tpu.vector_store %arg17[%c8_83, %c0_84], %62 {strides = array<i32>} : memref<24x16xf32, #tpu.memory_space<vmem>>, vector<8x16xf32>,
    %c0_85 = arith.constant 0 : index
    %c4_86 = arith.constant 4 : index
    %64 = vector.load %arg16[%c0_85, %c4_86] : memref<8x20xf32, #tpu.memory_space<vmem>>, vector<8x16xf32>
    %c16_87 = arith.constant 16 : index
    %c0_88 = arith.constant 0 : index
    %65 = vector.load %arg17[%c16_87, %c0_88] : memref<24x16xf32, #tpu.memory_space<vmem>>, vector<8x16xf32>
    tpu.vector_store %arg17[%c16_87, %c0_88], %64 {strides = array<i32>} : memref<24x16xf32, #tpu.memory_space<vmem>>, vector<8x16xf32>,
    %c0_89 = arith.constant 0 : index
    %c16_90 = arith.constant 16 : index
    %66 = vector.load %arg16[%c0_89, %c16_90] : memref<8x20xf32, #tpu.memory_space<vmem>>, vector<8x4xf32>
    %c0_91 = arith.constant 0 : index
    %c0_92 = arith.constant 0 : index
    %67 = vector.load %arg16[%c0_91, %c0_92] : memref<8x20xf32, #tpu.memory_space<vmem>>, vector<8x4xf32>
    tpu.vector_store %arg16[%c0_91, %c0_92], %66 {strides = array<i32>} : memref<8x20xf32, #tpu.memory_space<vmem>>, vector<8x4xf32>,
    %c0_93 = arith.constant 0 : index
    %c0_94 = arith.constant 0 : index
    %68 = vector.load %arg7[%c0_93, %c0_94] : memref<8x24xf32, #tpu.memory_space<vmem>>, vector<8x24xf32>
    %c0_95 = arith.constant 0 : index
    %c0_96 = arith.constant 0 : index
    %69 = vector.load %arg17[%c0_95, %c0_96] : memref<24x16xf32, #tpu.memory_space<vmem>>, vector<24x16xf32>
    %cst_97 = arith.constant dense<0.000000e+00> : vector<8x16xf32>
    %70 = tpu.matmul %68, %69, %cst_97 {dimension_numbers = #tpu.dot_dimension_numbers<[1], [0], [0], [1], [0, 0, 1, 1], [], []>} : vector<8x24xf32>, vector<24x16xf32>, vector<8x16xf32> -> vector<8x16xf32>
    %c8_98 = arith.constant 8 : index
    %c0_99 = arith.constant 0 : index
    %71 = vector.load %arg8[%c8_98, %c0_99] : memref<16x1xf32, #tpu.memory_space<vmem>>, vector<8x1xf32>
    %72 = vector.broadcast %71 : vector<8x1xf32> to vector<8x16xf32>
    %73 = arith.addf %70, %72 : vector<8x16xf32>
    %cst_100 = arith.constant 0.000000e+00 : f32
    %74 = vector.broadcast %cst_100 : f32 to vector<8x16xf32>
    %75 = arith.maximumf %73, %74 : vector<8x16xf32>
    %76 = arith.addf %41, %75 : vector<8x16xf32>
    %c0_101 = arith.constant 0 : index
    %c0_102 = arith.constant 0 : index
    %c0_103 = arith.constant 0 : index
    %77 = vector.load %arg9[%c0_101, %c0_102, %c0_103] : memref<1x8x16xf32, #tpu.memory_space<vmem>>, vector<1x8x16xf32>
    %78 = vector.shape_cast %77 : vector<1x8x16xf32> to vector<8x16xf32>
    %79 = vector.shape_cast %76 : vector<8x16xf32> to vector<1x8x16xf32>
    tpu.vector_store %arg9[%c0_101, %c0_102, %c0_103], %79 {strides = array<i32>} : memref<1x8x16xf32, #tpu.memory_space<vmem>>, vector<1x8x16xf32>,
    return
  }
  func.func @transform_0(%arg0: i32, %arg1: i32) -> (i32, i32, i32) {
    %c0_i32 = arith.constant 0 : i32
    %c0_i32_0 = arith.constant 0 : i32
    return %arg0, %c0_i32, %arg1 : i32, i32, i32
  }
  func.func @transform_1(%arg0: i32, %arg1: i32) -> (i32, i32) {
    %c0_i32 = arith.constant 0 : i32
    %c0_i32_0 = arith.constant 0 : i32
    %c0_i32_1 = arith.constant 0 : i32
    return %c0_i32, %c0_i32_0 : i32, i32
  }
  func.func @transform_2(%arg0: i32, %arg1: i32) -> (i32, i32) {
    %c0_i32 = arith.constant 0 : i32
    %c0_i32_0 = arith.constant 0 : i32
    %c0_i32_1 = arith.constant 0 : i32
    return %c0_i32, %c0_i32_0 : i32, i32
  }
  func.func @transform_3(%arg0: i32, %arg1: i32) -> (i32, i32) {
    %c0_i32 = arith.constant 0 : i32
    %c0_i32_0 = arith.constant 0 : i32
    %c0_i32_1 = arith.constant 0 : i32
    return %c0_i32, %c0_i32_0 : i32, i32
  }
  func.func @transform_4(%arg0: i32, %arg1: i32) -> (i32, i32) {
    %c0_i32 = arith.constant 0 : i32
    %c0_i32_0 = arith.constant 0 : i32
    %c0_i32_1 = arith.constant 0 : i32
    return %c0_i32, %c0_i32_0 : i32, i32
  }
  func.func @transform_5(%arg0: i32, %arg1: i32) -> (i32, i32) {
    %c0_i32 = arith.constant 0 : i32
    %c0_i32_0 = arith.constant 0 : i32
    %c0_i32_1 = arith.constant 0 : i32
    return %c0_i32, %c0_i32_0 : i32, i32
  }
  func.func @transform_6(%arg0: i32, %arg1: i32) -> (i32, i32) {
    %c0_i32 = arith.constant 0 : i32
    %c0_i32_0 = arith.constant 0 : i32
    %c0_i32_1 = arith.constant 0 : i32
    return %c0_i32, %c0_i32_0 : i32, i32
  }
  func.func @transform_7(%arg0: i32, %arg1: i32) -> (i32, i32, i32) {
    %c0_i32 = arith.constant 0 : i32
    %c0_i32_0 = arith.constant 0 : i32
    return %arg0, %c0_i32, %arg1 : i32, i32, i32
  }
}

</mosaic_0001>

<bundles_post_ra>
// kernel: tpu_custom_call.1
= control target key start
LH: loop header
LB: loop body
LE: loop exit
PB: predicated region body
PF: predicated region fallthrough
CT: control target
= control target key end

     0   :  { %12 = vsyncpa [#allocation11], 0  ;;  %s1347_s0 = inlined_call_operand.vmem [shape: f32[2,4,16], index: 0, kind: input, shape index: {}]   ;;  %s1348_s1 = inlined_call_operand.vmem [shape: f32[16,12], index: 1, kind: input, shape index: {}]   ;;  %s1349_s2 = inlined_call_operand.vmem [shape: f32[8,24], index: 2, kind: input, shape index: {}]   ;;  %s1350_s3 = inlined_call_operand.vmem [shape: f32[24,1], index: 3, kind: input, shape index: {}]   ;;  %s1351_s4 = inlined_call_operand.vmem [shape: f32[8,24], index: 4, kind: input, shape index: {}]   ;;  %s1352_s5 = inlined_call_operand.vmem [shape: f32[8,24], index: 5, kind: input, shape index: {}]   ;;  %s1353_s6 = inlined_call_operand.vmem [shape: f32[16,1], index: 6, kind: input, shape index: {}]   ;;  %s1354_s7 = inlined_call_operand.hbm [shape: f32[2,8,16], index: 7, kind: output, shape index: {}]  }
   0x1   :  { %14 = vsyncpa [#allocation11 + $0x1], 0  ;;  %s1146_s24 = smov 0   ;;  %s1148_s25 = smov 0  }
   0x2   :  { %s1150_s26 = smov 0   ;;  %s1152_s27 = smov 0  }
   0x3   :  { %s1154_s28 = smov 0   ;;  %s1156_s29 = smov 0  }
   0x4 LB: > { %s864_s30 = sadd.s32 4294967295, %s1092_s29   ;;  %s865_s8 = sadd.s32 4294967294, %s1092_s29   ;;  %s1092_s29 = sphi %s1156_s29, %s20_s29   ;;  %s1088_s28 = sphi %s1154_s28, %s1361_s28   ;;  %s1084_s27 = sphi %s1152_s27, %s1360_s27   ;;  %s1080_s26 = sphi %s1150_s26, %s1359_s26   ;;  %s1076_s25 = sphi %s1148_s25, %s1358_s25   ;;  %s1072_s24 = sphi %s1146_s24, %s1357_s24  }
   0x5   : > { %s32_s9 = sadd.s32 1, %s1088_s28  ;;  %s195_s10 = sadd.s32 1, %s1080_s26 }
   0x6   : > { %p34_p0 = scmp.ge.s32.totalorder %s32_s9, 2  ;;  %p205_p1 = scmp.ne.s32.totalorder %s1080_s26, %s1076_s25 }
   0x7   : > { %p206_p2 = scmp.eq.s32.totalorder %s864_s30, 1  ;;  %p211_p3 = scmp.ne.s32.totalorder %s1076_s25, %s1072_s24 }
   0x8   : > { %s1363_s9 = smov (%p34_p0, %s32_s9), 0  ;;  %p212_p5 = scmp.eq.s32.totalorder %s865_s8, 1 }
   0x9   : > { %p1186_p4 = por %p206_p2, %p205_p1  ;;  %s190_s12 = ssub.s32 %s1088_s28, %s1363_s9 }
   0xa   : > { %p868_p6 = scmp.ge.s32.totalorder %s1092_s29, 1  ;;  %p193_p7 = scmp.eq.s32.totalorder %s190_s12, 0 }
   0xb   : > { %p1193_p8 = por %p212_p5, %p211_p3  ;;  %p258_p9 = scmp.lt.s32.totalorder %s1092_s29, 3 }
   0xc   : > { %s1199_s14 = scalar_select %p193_p7, %s1080_s26, %s195_s10  }
   0xd   : > { %p259_p10 = pnand %p868_p6, %p258_p9 }
   0xe   : > { %p292_p11 = scmp.lt.s32.totalorder (!%p259_p10), %s1084_s27, 1  ;;  %vm303_vm0 = vcmask (!%p259_p10), 11264   ;;  %v1094_v0 = vmov (!%p259_p10), 0.0   ;;  %s1095_s20 = smov (!%p259_p10), 2   ;;  %vm315_vm1 = vcmask (!%p259_p10), 142352   ;;  %vm318_vm2 = vcmask (!%p259_p10), 125952  }
   0xf   : > { %262 = sbr.rel (%p259_p10) target bundleno = 1922 (0x782), region = 48  ;;  %304 = vst.msk [vmem:[#allocation2] sm:$0xf] (!%p259_p10), %vm303_vm0, %v1094_v0  ;;  %v339_v3 = vld [vmem:[%s1348_s1] sm:$0xff] (!%p259_p10)  ;;  %vm355_vm3 = vcmask (!%p259_p10), 97280   ;;  %s1096_s23 = smov (!%p259_p10), 126  }
  0x10   : > { %901 = vmatprep.mubr.msk.f32.mxu0 (!%p259_p10), %vm355_vm3, %v339_v3  ;;  %s1097_s30 = smov (!%p259_p10), 127   ;;  %v343_v7 = vld [vmem:[%s1350_s3] sm:$0xff] (!%p259_p10)  ;;  %v1098_v8 = vmov (!%p259_p10), 0   ;;  %vm362_vm4 = vcmask (!%p259_p10), 1043456   ;;  %vm1099_vm5 = vmmov (!%p259_p10), 1   ;;  %v340_v14 = vld [vmem:[%s1348_s1 + $0x8] sm:$0xff] (!%p259_p10) }
  0x11   : > { %1012 = vset.pattern.permute.xlu1 (!%p259_p10), %v1098_v8  ;;  %1013 = vset.pattern.permute.xlu0 (!%p259_p10), %v1098_v8  ;;  %vm932_vm6 = vmpackc.low (!%p259_p10), %vm362_vm4, %vm1099_vm5  ;;  %vm305_vm7 = vcmask (!%p259_p10), 15360   ;;  %v1100_v20 = vmov (!%p259_p10), 0.0|0.0   ;;  %vm446_vm8 = vcmask (!%p259_p10), 146448   ;;  %vm449_vm9 = vcmask (!%p259_p10), 130048   ;;  %v344_v23 = vld [vmem:[%s1350_s3 + $0x8] sm:$0xff] (!%p259_p10)  ;;  %v474_v24 = vld [vmem:[%s1350_s3 + $0x10] sm:$0xff] (!%p259_p10) }
  0x12   : > { %306 = vst.msk [vmem:[#allocation4] sm:$0xff] (!%p259_p10), %vm305_vm7, %v1094_v0  ;;  %937 = vmatprep.subr.bf16.mxu1 (!%p259_p10), %v1100_v20  ;;  %vm1101_vm10 = vmmov (!%p259_p10), 0   ;;  %v470_v30 = vld [vmem:[%s1349_s2] sm:$0xff] (!%p259_p10)  ;;  %vm480_vm11 = vcmask (!%p259_p10), 195584   ;;  %vm307_vm12 = vcmask (!%p259_p10), 31744   ;;  %s1102_s22 = smov (!%p259_p10), 4  }
  0x13   : > { %910 = vmatprep.mubr.msk.f32.mxu1 (!%p259_p10), %vm1101_vm10, %v1094_v0  ;;  %308 = vst.msk [vmem:[#allocation6] sm:$0xff] (!%p259_p10), %vm307_vm12, %v1094_v0  ;;  %309 = vst.msk [vmem:[#allocation8] sm:$0xff] (!%p259_p10), %vm307_vm12, %v1094_v0  ;;  %vm560_vm13 = vcmask (!%p259_p10), 162848   ;;  %v587_v42 = vld [vmem:[%s1353_s6] sm:$0xff] (!%p259_p10)  ;;  %v696_v57 = vld [vmem:[%s1353_s6 + $0x8] sm:$0xff] (!%p259_p10)  ;;  %s1104_s18 = smov (!%p259_p10), 112  }
  0x14   : > { %v583_v48 = vld [vmem:[%s1351_s4] sm:$0xff] (!%p259_p10) }
  0x15   : > { %v692_v3 = vld [vmem:[%s1352_s5] sm:$0xff] (!%p259_p10) }
  0x16   : > { %s293_s15 = scalar_select %p292_p11, %s1084_s27, 1 }
  0x18   : > { %s870_s16 = sshll.u32 %s293_s15, 2 }
  0x19   : > { %s298_s19 = scalar_lea.vmem %s1347_s0, %s870_s16 }
  0x1a   : > { %v310_v1 = vld [vmem:[%s298_s19] sm:$0xf] }
  0x1b   : > { %312 = vrot.lane.b32.xlu0 %v310_v1, %s1095_s20 }
  0x8d   : > { %v313_v2 = vpop.permute.xlu0 %312 }
  0x8e   : > { %316 = vst.msk [vmem:[#allocation2] sm:$0xf] %vm315_vm1, %v313_v2 }
  0x95   : > { %v326_v4 = vld [vmem:[#allocation2] sm:$0xf] }
  0x96   : > { %v320_v5 = vld [vmem:[#allocation2] sm:$0xf]  ;;  %328 = vrot.lane.b32.xlu1 %v326_v4, %s1096_s23 }
  0x97   : > { %v317_v6 = vld [vmem:[#allocation2] sm:$0xf]  ;;  %322 = vrot.lane.b32.xlu0 %v320_v5, %s1097_s30 }
  0x98   : > { %319 = vst.msk [vmem:[#allocation3] sm:$0xf] %vm318_vm2, %v317_v6  ;;  %v332_v58 = vld [vmem:[#allocation2] sm:$0xf] }
  0x9a   : > { %347 = vperm.xlu1 %1012, %v343_v7  }
 0x108   : > { %v329_v9 = vpop.permute.xlu1 %328 }
 0x109   : > { %v323_v10 = vpop.permute.xlu0 %322  ;;  %331 = vst.msk [vmem:[#allocation3 + $0x8] sm:$0xf] %vm318_vm2, %v329_v9 }
 0x10a   : > { %325 = vst.msk [vmem:[#allocation3 + $0x4] sm:$0xf] %vm318_vm2, %v323_v10 }
 0x110   : > { %v342_v12 = vld [vmem:[#allocation3 + $0x8] sm:$0xf] }
 0x111   : > { %v341_v11 = vld [vmem:[#allocation3] sm:$0xff] }
 0x112   : > { %v931_v13 = vpack.c.bf16 %v342_v12, %v341_v11 }
 0x114   : > { %933 = vmatprep.subr.msk.bf16.mxu0 %vm932_vm6, %v931_v13 }
 0x115   : > { %936 = vmatpush3.bf16.msk.msra.mxu0 %vm932_vm6, %v931_v13 }
 0x116   : > { %940 = vmatprep.subr.bf16.mxu0 %v1100_v20 }
 0x118   : > { %902 = vmatmul.mubr.msk.f32.vlgmr.msra.gmra.mrb[0].mxu0 %vm355_vm3, %v340_v14 }
 0x119   : > { %v348_v15 = vpop.permute.xlu1 %347  ;;  %919 = vmatprep.mubr.msk.f32.mxu0 %vm1101_vm10, %v1094_v0 }
 0x1eb   : > { %v903_v16 = vpop.f32.mrb[0].mxu0 }
 0x1ec   : > { %v432_v17 = vpop.f32.mrb[1].mxu0 }
 0x1ed   : > { %v433_v18 = vadd.f32 %v432_v17, %v348_v15 }
 0x1ef   : > { %v441_v19 = vmax.f32 %v433_v18, 0.0 }
 0x1f1   : > { %443 = vrot.lane.b32.xlu0 %v441_v19, %s1095_s20  ;;  %s289_s20 = sand.u32 1, %s1076_s25  }
 0x1f2   : > { %s869_s21 = sshll.u32 %s289_s20, 3  ;;  %s779_s16 = scalar_lea.sflag [#allocation11], %s289_s20 }
 0x263   : > { %v444_v21 = vpop.permute.xlu0 %443 }
 0x264   : > { %447 = vst.msk [vmem:[#allocation4] sm:$0xff] %vm446_vm8, %v444_v21 }
 0x26b   : > { %v1228_v22 = vld [vmem:[#allocation4] sm:$0xff] }
 0x26c   : > { %459 = vrot.lane.b32.xlu0 %v1228_v22, %s1096_s23  ;;  %453 = vrot.lane.b32.xlu1 %v1228_v22, %s1097_s30  ;;  %450 = vst.msk [vmem:[#allocation5] sm:$0xff] %vm449_vm9, %v1228_v22  ;;  %s1103_s30 = smov 124  }
 0x270   : > { %352 = vperm.xlu0 %1013, %v344_v23   ;;  %477 = vperm.xlu1 %1012, %v474_v24  }
 0x273   : > { %v471_v27 = vld [vmem:[#allocation5] sm:$0xff] }
 0x2de   : > { %v460_v25 = vpop.permute.xlu0 %459  ;;  %v454_v26 = vpop.permute.xlu1 %453 }
 0x2df   : > { %462 = vst.msk [vmem:[#allocation5 + $0x10] sm:$0xff] %vm449_vm9, %v460_v25  ;;  %456 = vst.msk [vmem:[#allocation5 + $0x8] sm:$0xff] %vm449_vm9, %v454_v26 }
 0x2e6   : > { %v472_v28 = vld [vmem:[#allocation5 + $0x8] sm:$0xff]  ;;  %v473_v31 = vld [vmem:[#allocation5 + $0x10] sm:$0xff] }
 0x2e7   : > { %v938_v29 = vpack.c.bf16 %v472_v28, %v471_v27 }
 0x2e9   : > { %939 = vmatpush3.bf16.msra.mxu1 %v938_v29 }
 0x2ea   : > { %908 = vmatprep.subr.mxu1 %v1094_v0 }
 0x2ed   : > { %909 = vmatpush3.msra.mxu1 %v473_v31 }
 0x2ee   : > { %911 = vmatmul.mubr.msk.f32.vlgmr.msra.gmra.mrb[0].mxu1 %vm480_vm11, %v470_v30  ;;  %943 = vmatprep.subr.bf16.mxu1 %v1100_v20 }
 0x2ef   : > { %928 = vmatprep.mubr.msk.f32.mxu1 %vm1101_vm10, %v1094_v0  ;;  %v353_v32 = vpop.permute.xlu0 %352  ;;  %v478_v33 = vpop.permute.xlu1 %477 }
 0x2f0   : > { %v438_v37 = vadd.f32 %v903_v16, %v353_v32 }
 0x3c1   : > { %v550_v34 = vpop.f32.mrb[0].mxu1 }
 0x3c2   : > { %v551_v35 = vadd.f32 %v550_v34, %v478_v33  ;;  %v912_v36 = vpop.f32.mrb[1].mxu1 }
 0x3c4   : > { %v554_v38 = vmax.f32 %v551_v35, 0.0 }
 0x3c6   : > { %v1259_v39 = vadd.f32 %v554_v38, %v438_v37 }
 0x3c8   : > { %557 = vrot.lane.b32.xlu1 %v1259_v39, %s1102_s22 }
 0x43a   : > { %v558_v40 = vpop.permute.xlu1 %557 }
 0x43b   : > { %561 = vst.msk [vmem:[#allocation6] sm:$0xff] %vm560_vm13, %v558_v40 }
 0x442   : > { %v562_v41 = vld [vmem:[#allocation6] sm:$0xff] }
 0x443   : > { %563 = vst.msk [vmem:[#allocation7] sm:$0xff] %vm449_vm9, %v562_v41  ;;  %572 = vrot.lane.b32.xlu0 %v562_v41, %s1103_s30  ;;  %566 = vrot.lane.b32.xlu1 %v562_v41, %s1096_s23 }
 0x447   : > { %590 = vperm.xlu1 %1012, %v587_v42  }
 0x44a   : > { %v584_v45 = vld [vmem:[#allocation7] sm:$0xff] }
 0x4b5   : > { %v573_v43 = vpop.permute.xlu0 %572  ;;  %v567_v44 = vpop.permute.xlu1 %566 }
 0x4b6   : > { %575 = vst.msk [vmem:[#allocation7 + $0x10] sm:$0xff] %vm449_vm9, %v573_v43  ;;  %569 = vst.msk [vmem:[#allocation7 + $0x8] sm:$0xff] %vm449_vm9, %v567_v44 }
 0x4bd   : > { %v585_v46 = vld [vmem:[#allocation7 + $0x8] sm:$0xff]  ;;  %v586_v49 = vld [vmem:[#allocation7 + $0x10] sm:$0xff] }
 0x4be   : > { %v941_v47 = vpack.c.bf16 %v585_v46, %v584_v45 }
 0x4c0   : > { %942 = vmatpush3.bf16.msra.mxu0 %v941_v47 }
 0x4c1   : > { %917 = vmatprep.subr.mxu0 %v1094_v0 }
 0x4c4   : > { %918 = vmatpush3.msra.mxu0 %v586_v49 }
 0x4c5   : > { %920 = vmatmul.mubr.msk.f32.vlgmr.msra.gmra.mrb[2].mxu0 %vm480_vm11, %v583_v48 }
 0x4c6   : > { %v591_v50 = vpop.permute.xlu1 %590 }
 0x598   : > { %v662_v51 = vpop.f32.mrb[2].mxu0 }
 0x599   : > { %v663_v52 = vadd.f32 %v662_v51, %v591_v50  ;;  %v921_v53 = vpop.f32.mrb[3].mxu0 }
 0x59b   : > { %v666_v54 = vmax.f32 %v663_v52, 0.0 }
 0x59d   : > { %668 = vrot.lane.b32.xlu0 %v666_v54, %s1102_s22  ;;  %s878_s22 = sshll.u32 %s1084_s27, 7  ;;  %s1105_s27 = smov [#allocation10]  }
 0x59e   : > { %s1299_s15 = scalar_lea.hbm %s1354_s7, %s878_s22 }
 0x60f   : > { %v669_v55 = vpop.permute.xlu0 %668 }
 0x610   : > { %671 = vst.msk [vmem:[#allocation8] sm:$0xff] %vm560_vm13, %v669_v55 }
 0x617   : > { %v672_v56 = vld [vmem:[#allocation8] sm:$0xff] }
 0x618   : > { %673 = vst.msk [vmem:[#allocation9] sm:$0xff] %vm449_vm9, %v672_v56  ;;  %682 = vrot.lane.b32.xlu0 %v672_v56, %s1103_s30  ;;  %676 = vrot.lane.b32.xlu1 %v672_v56, %s1096_s23  ;;  %s291_s30 = scalar_lea.vmem [#allocation10], %s869_s21 }
 0x619   : > { %s793_s8 = sshll.u32 %s291_s30, 4  ;;  %s1301_s8 = int_to_ptr.vmem [resolvable:$true] %s793_s8 }
 0x61a   : > { %s1014_s17 = scalar_lea.vmem %s1301_s8, 128 }
 0x61b   : > { %p1015_p12 = scmp.ne.s32.totalorder %s1301_s8, %s1014_s17 }
 0x61c   : > { %334 = vrot.lane.b32.xlu0 %v332_v58, %s1104_s18  ;;  %699 = vperm.xlu1 %1012, %v696_v57  }
 0x61d   : > { %p1016_p13 = pnand %p1015_p12, %p1186_p4 }
 0x61f   : > { %v693_v63 = vld [vmem:[#allocation9] sm:$0xff]  ;;  %p1017_p0 = pneg %p1016_p13 }
 0x620   : > { %578 = vrot.lane.b32.xlu0 %v562_v41, %s1104_s18  ;;  %465 = vrot.lane.b32.xlu1 %v1228_v22, %s1104_s18 }
 0x624   : > { %688 = vrot.lane.b32.xlu1 %v672_v56, %s1104_s18  ;;  %s1018_s18 = sshll.u32 %s1105_s27, 4  ;;  %s1019_s18 = int_to_ptr.vmem [resolvable:$false] %s1018_s18 }
 0x625   : > { %s1020_s23 = scalar_lea.vmem %s1019_s18, 256  ;;  %p1021_p1 = scmp.lt.s32.totalorder %s1301_s8, %s1019_s18 }
 0x626   : > { %p1022_p2 = scmp.lt.s32.totalorder %s1020_s23, %s1014_s17 }
 0x628   : > { %p1023_p3 = por %p1022_p2, %p1021_p1 }
 0x62a   : > { %p1024_p5 = pnand %p1023_p3, %p1017_p0 }
 0x68a   : > { %v683_v59 = vpop.permute.xlu0 %682  ;;  %v677_v60 = vpop.permute.xlu1 %676 }
 0x68b   : > { %685 = vst.msk [vmem:[#allocation9 + $0x10] sm:$0xff] %vm449_vm9, %v683_v59  ;;  %679 = vst.msk [vmem:[#allocation9 + $0x8] sm:$0xff] %vm449_vm9, %v677_v60 }
 0x68e   : > { %v335_v61 = vpop.permute.xlu0 %334 }
 0x68f   : > { %338 = vst.msk [vmem:[#allocation2] sm:$0xf] %vm303_vm0, %v335_v61 }
 0x692   : > { %v579_v62 = vpop.permute.xlu0 %578  ;;  %v694_v1 = vld [vmem:[#allocation9 + $0x8] sm:$0xff]  ;;  %v695_v4 = vld [vmem:[#allocation9 + $0x10] sm:$0xff] }
 0x693   : > { %582 = vst.msk [vmem:[#allocation6] sm:$0xff] %vm307_vm12, %v579_v62  ;;  %v944_v2 = vpack.c.bf16 %v694_v1, %v693_v63 }
 0x695   : > { %945 = vmatpush3.bf16.msra.mxu1 %v944_v2 }
 0x696   : > { %926 = vmatprep.subr.mxu1 %v1094_v0 }
 0x699   : > { %927 = vmatpush3.msra.mxu1 %v695_v4 }
 0x69a   : > { %929 = vmatmul.mubr.msk.f32.vlgmr.msra.gmra.mrb[2].mxu1 %vm480_vm11, %v692_v3 }
 0x69b   : > { %v700_v5 = vpop.permute.xlu1 %699 }
 0x69f   : > { %v466_v6 = vpop.permute.xlu1 %465 }
 0x6a0   : > { %469 = vst.msk [vmem:[#allocation4] sm:$0xff] %vm305_vm7, %v466_v6 }
 0x6a3   : > { %v689_v7 = vpop.permute.xlu1 %688 }
 0x6a4   : > { %691 = vst.msk [vmem:[#allocation8] sm:$0xff] %vm307_vm12, %v689_v7 }
 0x76d   : > { %v771_v8 = vpop.f32.mrb[2].mxu1 }
 0x76e   : > { %v772_v0 = vadd.f32 %v771_v8, %v700_v5  ;;  %v930_v9 = vpop.f32.mrb[3].mxu1 }
 0x770   : > { %v775_v10 = vmax.f32 %v772_v0, 0.0 }
 0x772   : > { %v776_v11 = vadd.f32 %v775_v10, %v1259_v39 }
 0x774   : > { %777 = vst.msk [vmem:[%s291_s30] sm:$0xff] %vm449_vm9, %v776_v11 }
 0x775   : > { %1027 = shalt.err (!%p1024_p5)
}
 0x776   : > { %s1028_s19 = scalar_lea.hbm %s1299_s15, 128  ;;  %s1032_s22 = scalar_lea.hbm %s1354_s7, 256 }
 0x777   : > { %p1029_p6 = scmp.ne.s32.totalorder %s1299_s15, %s1028_s19  ;;  %p1033_p10 = scmp.lt.u32.totalorder %s1299_s15, %s1354_s7 }
 0x778   : > { %p1034_p11 = scmp.lt.u32.totalorder %s1032_s22, %s1028_s19  ;;  %p1036_p13 = scmp.lt.u32.totalorder %s1028_s19, %s1299_s15 }
 0x779   : > { %p1030_p7 = pnand %p1029_p6, %p1186_p4 }
 0x77a   : > { %p1035_p12 = por %p1034_p11, %p1033_p10 }
 0x77b   : > { %p1031_p9 = pneg %p1030_p7 }
 0x77c   : > { %p1037_p0 = por %p1036_p13, %p1035_p12 }
 0x77e   : > { %p1038_p1 = pnand %p1037_p0, %p1031_p9 }
 0x780   : > { %1041 = shalt.err (!%p1038_p1)
}
 0x781   : > { %946 = dma.vmem_to_hbm [thread:$0]  (%p1186_p4), %s1301_s8, 128, %s1299_s15, %s779_s16  }
 0x782 PF: > { %p952_p2 = scmp.ge.s32.totalorder %s1092_s29, 2  ;;  %s805_s12 = sand.u32 1, %s1072_s24  }
 0x783   : > { %s806_s17 = scalar_lea.sflag [#allocation11], %s805_s12 }
 0x784   : > { %p949_p3 = pnand %p952_p2, %p1193_p8 }
 0x786   : > { %1067 = dma.done.wait (!%p949_p3), %s806_s17, 128  }
 0x787   : > { %1069 = vsyncadd (!%p949_p3), %s806_s17, 4294967168  ;;  %s20_s29 = sadd.s32 1, %s1092_s29   ;;  %s1357_s24 = smov %s1076_s25 }
 0x788   : > { %p17_p5 = scmp.ge.s32.totalorder %s20_s29, 4   ;;  %s1358_s25 = smov %s1080_s26 }
 0x789   : > { %s1359_s26 = smov %s1199_s14  ;;  %s1360_s27 = smov %s1088_s28 }
 0x78a   : > { %s1361_s28 = smov %s1363_s9  ;;  %19 = sbr.rel (!%p17_p5) target bundleno = 4 (0x4), region = 87 }
 0x791   :  { %811 = vsyncpa [#allocation11], 1 }
 0x792   :  { %813 = vsyncpa [#allocation11 + $0x1], 1 }

</bundles_post_ra>
